<compile_context>
chip_gen: v5e
topology: v5e:2x2
jax: 0.10.0
libtpu: 0.0.40
codegen_flags: <defaults>
</compile_context>

<pallas_src>
import jax
import jax.numpy as jnp
from jax import lax
from jax.experimental import pallas as pl
from jax.experimental.pallas import tpu as pltpu


def _linear_kernel(x_ref, w_ref, b_ref, o_ref):
    # x_ref: (TB, C) VMEM tile
    # w_ref: (1, C)  VMEM, lane-dense, resident across the grid
    # b_ref: (1,)    SMEM scalar
    # o_ref: (1, TB) VMEM, lane-dense output block
    acc = lax.dot_general(
        w_ref[...], x_ref[...],
        dimension_numbers=(((1,), (1,)), ((), ())),   # contract C of both -> (1, TB)
        preferred_element_type=jnp.float32,
    )
    o_ref[...] = (acc + b_ref[0]).astype(o_ref.dtype)


def regression_fc_net1(x, weight, bias, *, tb=512):
    """Forward pass of RegressionFCNet1.

    x:      (B, C) float32
    weight: (1, C) float32  (PyTorch nn.Linear layout, kept lane-dense)
    bias:   (1,)   float32
    returns q = squeeze(x @ weight.T + bias)  -> shape (B,)  (scalar if B == 1)
    """
    B, C = x.shape

    # Batch tile: big lane-dense tiles when B is large, one padded tile otherwise.
    if B <= tb:
        tb = max(8, ((B + 7) // 8) * 8)          # round up to a sublane multiple
    b_pad = pl.cdiv(B, tb) * tb
    if b_pad != B:
        x = jnp.pad(x, ((0, b_pad - B), (0, 0)))  # zero rows -> harmless, sliced off
    num_tiles = b_pad // tb

    out = pl.pallas_call(
        _linear_kernel,
        out_shape=jax.ShapeDtypeStruct((1, b_pad), x.dtype),
        grid=(num_tiles,),
        in_specs=[
            pl.BlockSpec((tb, C), lambda i: (i, 0)),                  # x batch tile
            pl.BlockSpec((1, C), lambda i: (0, 0)),                   # weight, lane-dense
            pl.BlockSpec(memory_space=pltpu.MemorySpace.SMEM),        # bias scalar
        ],
        out_specs=pl.BlockSpec((1, tb), lambda i: (0, i)),            # lane-dense output
        compiler_params=pltpu.CompilerParams(
            dimension_semantics=("parallel",),    # shards batch across v7x's 2 TCs
        ),
    )(x, weight, bias)

    q = out.reshape(-1)[:B]
    # torch .squeeze(): (B, 1) -> (B,), and (1, 1) -> scalar when B == 1
    return jnp.squeeze(q)


if __name__ == "__main__":
    key = jax.random.PRNGKey(0)

    # Small shapes consistent with the module (Linear(in_channel -> 1)).
    in_channel = 32
    batch = 8

    k_x, k_w, k_b = jax.random.split(key, 3)
    bound = 1.0 / jnp.sqrt(jnp.float32(in_channel))
    weight = jax.random.uniform(k_w, (1, in_channel), jnp.float32, -bound, bound)
    bias = jax.random.uniform(k_b, (1,), jnp.float32, -bound, bound)
    x = jax.random.normal(k_x, (batch, in_channel), jnp.float32)

    q = jax.block_until_ready(regression_fc_net1(x, weight, bias))
    q_ref = jnp.squeeze(x @ weight.T + bias)
    assert q.shape == (batch,), q.shape
    assert jnp.allclose(q, q_ref, atol=1e-5, rtol=1e-5)

    # Larger, non-tile-multiple batch to exercise the tiled + padded path.
    C2 = 256
    B2 = 1040
    k_x2, k_w2 = jax.random.split(jax.random.fold_in(key, 1))
    bound2 = 1.0 / jnp.sqrt(jnp.float32(C2))
    w2 = jax.random.uniform(k_w2, (1, C2), jnp.float32, -bound2, bound2)
    x2 = jax.random.normal(k_x2, (B2, C2), jnp.float32)

    q2 = jax.block_until_ready(regression_fc_net1(x2, w2, bias))
    q2_ref = jnp.squeeze(x2 @ w2.T + bias)
    assert q2.shape == (B2,), q2.shape
    assert jnp.allclose(q2, q2_ref, atol=1e-4, rtol=1e-4)

    print("KERNEL_OK")
</pallas_src>

<mosaic_0001>
module attributes {stable_mosaic.version = 11 : i64} {
  func.func @_linear_kernel(%arg0: i32, %arg1: memref<8x32xf32, #tpu.memory_space<vmem>>, %arg2: memref<1x32xf32, #tpu.memory_space<vmem>>, %arg3: memref<1xf32, #tpu.memory_space<smem>>, %arg4: memref<1x8xf32, #tpu.memory_space<vmem>>) attributes {dimension_semantics = [#tpu.dimension_semantics<parallel>], iteration_bounds = array<i64: 1>, scalar_prefetch = 0 : i64, scratch_operands = 0 : i64, tpu.core_type = #tpu.core_type<tc>, window_params = [{transform_indices = @transform_0, window_bounds = array<i64: 8, 32>}, {pipeline_mode = #tpu.pipeline_mode<synchronous>, transform_indices = @transform_1, window_bounds = array<i64: 1, 32>}, {transform_indices = @transform_2, window_bounds = array<i64: 1>}, {transform_indices = @transform_3, window_bounds = array<i64: 1, 8>}]} {
    %c0 = arith.constant 0 : index
    %c0_0 = arith.constant 0 : index
    %0 = vector.load %arg2[%c0, %c0_0] : memref<1x32xf32, #tpu.memory_space<vmem>>, vector<1x32xf32>
    %c0_1 = arith.constant 0 : index
    %c0_2 = arith.constant 0 : index
    %1 = vector.load %arg1[%c0_1, %c0_2] : memref<8x32xf32, #tpu.memory_space<vmem>>, vector<8x32xf32>
    %cst = arith.constant dense<0.000000e+00> : vector<1x8xf32>
    %2 = tpu.matmul %0, %1, %cst {dimension_numbers = #tpu.dot_dimension_numbers<[1], [1], [0], [0], [0, 0, 1, 0], [], []>} : vector<1x32xf32>, vector<8x32xf32>, vector<1x8xf32> -> vector<1x8xf32>
    %c0_3 = arith.constant 0 : index
    %3 = memref.load %arg3[%c0_3] : memref<1xf32, #tpu.memory_space<smem>>
    %4 = vector.broadcast %3 : f32 to vector<1x8xf32>
    %5 = arith.addf %2, %4 : vector<1x8xf32>
    %c0_4 = arith.constant 0 : index
    %c0_5 = arith.constant 0 : index
    %6 = vector.load %arg4[%c0_4, %c0_5] : memref<1x8xf32, #tpu.memory_space<vmem>>, vector<1x8xf32>
    tpu.vector_store %arg4[%c0_4, %c0_5], %5 {strides = array<i32>} : memref<1x8xf32, #tpu.memory_space<vmem>>, vector<1x8xf32>,
    return
  }
  func.func @transform_0(%arg0: i32) -> (i32, i32) {
    %c0_i32 = arith.constant 0 : i32
    %c0_i32_0 = arith.constant 0 : i32
    return %arg0, %c0_i32 : i32, i32
  }
  func.func @transform_1(%arg0: i32) -> (i32, i32) {
    %c0_i32 = arith.constant 0 : i32
    %c0_i32_0 = arith.constant 0 : i32
    %c0_i32_1 = arith.constant 0 : i32
    return %c0_i32, %c0_i32_0 : i32, i32
  }
  func.func @transform_2(%arg0: i32) -> i32 {
    %c0_i32 = arith.constant 0 : i32
    %c0_i32_0 = arith.constant 0 : i32
    return %c0_i32 : i32
  }
  func.func @transform_3(%arg0: i32) -> (i32, i32) {
    %c0_i32 = arith.constant 0 : i32
    %c0_i32_0 = arith.constant 0 : i32
    return %c0_i32, %arg0 : i32, i32
  }
}

</mosaic_0001>

<bundles_post_ra>
// kernel: tpu_custom_call.1
= control target key start
LH: loop header
LB: loop body
LE: loop exit
PB: predicated region body
PF: predicated region fallthrough
CT: control target
= control target key end

     0   :  { %9 = vsyncpa [#allocation4], 0  ;;  %s170_s0 = inlined_call_operand.hbm [shape: f32[8,32], index: 0, kind: input, shape index: {}]   ;;  %s171_s1 = inlined_call_operand.vmem [shape: f32[1,32], index: 1, kind: input, shape index: {}]   ;;  %s172_s2 = inlined_call_operand.<no memory space> [shape: f32[1], index: 2, kind: input, shape index: {}]   ;;  %s173_s3 = inlined_call_operand.hbm [shape: f32[1,8], index: 3, kind: output, shape index: {}]  }
   0x1   :  { %10 = vsyncpa [#allocation5], 0  ;;  %s16_s14 = sshll.u32 %s170_s0, 4  ;;  %s136_s15 = smov [#allocation3]   ;;  %s17_s14 = int_to_ptr.hbm [resolvable:$true] %s16_s14 }
   0x2   :  { %s18_s16 = sshll.u32 %s136_s15, 4  ;;  %s19_s16 = int_to_ptr.vmem [resolvable:$true] %s18_s16 }
   0x3   :  { %21 = dma.hbm_to_vmem [thread:$0]  %s17_s14, 128, %s19_s16, [#allocation4]  }
   0x4   :  { %132 = dma.done.wait [#allocation4], 128  }
   0x5   :  { %133 = vsyncadd [#allocation4], 4294967168  ;;  %vm34_vm0 = vcmask 261120   ;;  %v31_v0 = vld [vmem:[#allocation3] sm:$0xff]  ;;  %v33_v2 = vstv %s172_s2  ;;  %s137_s0 = smov [#allocation6]   ;;  %s70_s24 = sshll.u32 %s173_s3, 4  ;;  %s71_s24 = int_to_ptr.hbm [resolvable:$true] %s70_s24 }
   0x6   :  { %80 = vmatpush.xpose.msk.msra.mxu0 %vm34_vm0, %v31_v0  ;;  %v30_v1 = vld [vmem:[%s171_s1] sm:$0x1]  ;;  %s68_s21 = sshll.u32 %s137_s0, 4  ;;  %vm61_vm1 = vcmask 57344   ;;  %s69_s21 = int_to_ptr.vmem [resolvable:$true] %s68_s21 }
   0x9   :  { %81 = vmatmul.msk.f32.vlgmr.msra.gmra.mxu0 %vm34_vm0, %v30_v1 }
  0x86   :  { %v58_v3 = vpop.f32.mrf.mxu0 }
  0x87   :  { %v59_v4 = vadd.f32 %v58_v3, %v33_v2 }
  0x89   :  { %62 = vst.msk [vmem:[#allocation6] sm:$0x1] %vm61_vm1, %v59_v4 }
  0x8a   :  { %73 = dma.vmem_to_hbm [thread:$0]  %s69_s21, 16, %s71_s24, [#allocation5]  }
  0x8b   :  { %134 = dma.done.wait [#allocation5], 16  }
  0x8c   :  { %135 = vsyncadd [#allocation5], 4294967280 }
  0x8d   :  { %78 = vsyncpa [#allocation4], 1 }
  0x8e   :  { %79 = vsyncpa [#allocation5], 1 }

</bundles_post_ra>
